<compile_context>
chip_gen: v6e
topology: v6e:2x2x1
jax: 0.10.0
libtpu: 0.0.40
codegen_flags: <defaults>
</compile_context>

<pallas_src>
import functools
import math

import jax
import jax.numpy as jnp
from jax import lax
from jax.experimental import pallas as pl
from jax.experimental.pallas import tpu as pltpu

_INV_SQRT2 = 1.0 / math.sqrt(2.0)


def _geglu_kernel(x_ref, w_ref, b_ref, o_ref, *, tn, approximate):
    # One wide matmul over the packed [hidden | gate] column block:
    #   hg = x @ W_packed[j]  -> (tm, 2*tn), f32 accumulation on the MXU.
    x = x_ref[...]
    hg = jnp.dot(x, w_ref[...], preferred_element_type=jnp.float32)
    hg = hg + b_ref[...].astype(jnp.float32)
    h = hg[:, :tn]        # hidden half  (static lane slice, multiple of 128)
    g = hg[:, tn:]        # gate half
    if approximate:
        # tanh-approx GELU: single EUP op, frees the VALU slot (numerics differ
        # slightly from F.gelu's exact erf default).
        gelu_g = jax.nn.gelu(g, approximate=True)
    else:
        gelu_g = 0.5 * g * (1.0 + lax.erf(g * _INV_SQRT2))
    o_ref[...] = (h * gelu_g).astype(o_ref.dtype)


def _round_up(x, m):
    return ((x + m - 1) // m) * m


@functools.partial(
    jax.jit,
    static_argnames=("tm", "tn", "compute_dtype", "out_dtype", "approximate"),
)
def geglu_pallas(x, w, b, *, tm=512, tn=256, compute_dtype=jnp.bfloat16,
                 out_dtype=None, approximate=False):
    """x: (..., dim_in); w: (dim_in, 2*dim_out) [transposed vs torch]; b: (2*dim_out,)."""
    *lead, dim_in = x.shape
    two_dout = w.shape[1]
    dim_out = two_dout // 2
    out_dtype = x.dtype if out_dtype is None else out_dtype

    M = 1
    for d in lead:
        M *= d

    # ---- N tile: multiple of 128 that divides dim_out (1280 -> 256).
    if dim_out % tn == 0:
        tn_eff = tn
    elif dim_out % 256 == 0:
        tn_eff = 256
    else:
        assert dim_out % 128 == 0, "dim_out must be a multiple of 128"
        tn_eff = 128
    n_blocks = dim_out // tn_eff

    # ---- M tile: pick the number of M blocks first, then size the tile so the
    # pad is at most one sublane group (16 rows for bf16) instead of a full tile.
    mult = 16 if jnp.dtype(compute_dtype) == jnp.dtype(jnp.bfloat16) else 8
    bpe_c = jnp.dtype(compute_dtype).itemsize
    bpe_o = jnp.dtype(out_dtype).itemsize

    def _vmem_estimate(tm_try):
        per_step = (tm_try * dim_in * bpe_c            # x block
                    + dim_in * 2 * tn_eff * bpe_c      # packed W block
                    + 2 * tn_eff * 4                   # packed bias block
                    + tm_try * tn_eff * bpe_o)         # output block
        # double-buffered streams + f32 hg/gelu intermediates + headroom
        return 2 * per_step + 4 * tm_try * 2 * tn_eff * 4 + (4 << 20)

    tm_max = max(mult, tm)
    while tm_max > mult and _vmem_estimate(tm_max) > (56 << 20):
        tm_max //= 2
    n_m_blocks = -(-M // tm_max)
    tm_eff = min(_round_up(-(-M // n_m_blocks), mult), _round_up(M, mult))
    M_pad = _round_up(M, tm_eff)

    x2d = x.reshape(M, dim_in).astype(compute_dtype)
    if M_pad != M:
        # TODO(synk): a masked store on the ragged last M block would avoid this
        # extra pad pass over x; the pad is at most `mult-1` rows here.
        x2d = jnp.pad(x2d, ((0, M_pad - M), (0, 0)))

    # ---- One-time packed layouts: per output block j, hidden cols j sit next
    # to gate cols j so each weight/bias block is a single contiguous DMA.
    w_h = w[:, :dim_out].reshape(dim_in, n_blocks, tn_eff)
    w_g = w[:, dim_out:].reshape(dim_in, n_blocks, tn_eff)
    w_packed = (jnp.concatenate([w_h, w_g], axis=-1)          # (dim_in, nb, 2*tn)
                .transpose(1, 0, 2)                            # (nb, dim_in, 2*tn)
                .astype(compute_dtype))
    b_h = b[:dim_out].reshape(n_blocks, 1, tn_eff)
    b_g = b[dim_out:].reshape(n_blocks, 1, tn_eff)
    b_packed = jnp.concatenate([b_h, b_g], axis=-1).astype(jnp.float32)

    # TODO(synk): for very large dim_in (>~8K) reintroduce a K grid axis with an
    # f32 accumulator; this UNet GEGLU always fits a full-K strip in VMEM.

    grid = (M_pad // tm_eff, n_blocks)
    vmem_limit = min(max(_vmem_estimate(tm_eff), 32 << 20), 56 << 20)

    kernel = functools.partial(_geglu_kernel, tn=tn_eff, approximate=approximate)

    out2d = pl.pallas_call(
        kernel,
        out_shape=jax.ShapeDtypeStruct((M_pad, dim_out), out_dtype),
        grid_spec=pltpu.PrefetchScalarGridSpec(
            num_scalar_prefetch=0,
            grid=grid,
            in_specs=[
                pl.BlockSpec((tm_eff, dim_in), lambda i, j: (i, 0)),        # x strip (full K)
                pl.BlockSpec((None, dim_in, 2 * tn_eff), lambda i, j: (j, 0, 0)),  # packed W block
                pl.BlockSpec((None, 1, 2 * tn_eff), lambda i, j: (j, 0, 0)),        # packed bias
            ],
            out_specs=pl.BlockSpec((tm_eff, tn_eff), lambda i, j: (i, j)),
        ),
        compiler_params=pltpu.CompilerParams(
            dimension_semantics=("parallel", "parallel"),
            vmem_limit_bytes=int(vmem_limit),
        ),
    )(x2d, w_packed, b_packed)

    if M_pad != M:
        out2d = out2d[:M]
    return out2d.reshape(*lead, dim_out)


def geglu_ref(x, w, b):
    h = jnp.dot(x, w, precision=lax.Precision.HIGHEST) + b
    dim_out = w.shape[1] // 2
    a, g = h[..., :dim_out], h[..., dim_out:]
    return a * (0.5 * g * (1.0 + lax.erf(g * _INV_SQRT2)))


if __name__ == "__main__":
    # Module defaults (dim_in=320, dim_out=1280) with a small batch*seq.
    batch, seq = 2, 8
    dim_in, dim_out = 320, 1280

    key = jax.random.PRNGKey(0)
    kx, kw, kb = jax.random.split(key, 3)

    x = jax.random.normal(kx, (batch, seq, dim_in), dtype=jnp.float32)
    # PyTorch Linear weight is (2*dim_out, dim_in); we keep the transposed
    # (dim_in, 2*dim_out) layout for the matmul (one-time conversion).
    bound = 1.0 / (dim_in ** 0.5)
    w = jax.random.uniform(kw, (dim_in, 2 * dim_out), jnp.float32, -bound, bound)
    b = jax.random.uniform(kb, (2 * dim_out,), jnp.float32, -bound, bound)

    out = geglu_pallas(x, w, b)            # bf16 operands, f32 accum, f32 out
    jax.block_until_ready(out)
    assert out.shape == (batch, seq, dim_out)

    # Reference on the same bf16-rounded operands (products are exact in f32,
    # so only accumulation order differs from the MXU path).
    xq = x.astype(jnp.bfloat16).astype(jnp.float32)
    wq = w.astype(jnp.bfloat16).astype(jnp.float32)
    ref = geglu_ref(xq, wq, b)
    err = float(jnp.max(jnp.abs(out - ref)))
    assert jnp.allclose(out, ref, atol=2e-3, rtol=2e-3), err

    print("KERNEL_OK")
</pallas_src>

<mosaic_0001>
module attributes {stable_mosaic.version = 11 : i64} {
  func.func @_geglu_kernel(%arg0: i32, %arg1: i32, %arg2: memref<16x320xbf16, #tpu.memory_space<vmem>>, %arg3: memref<1x320x512xbf16, #tpu.memory_space<vmem>>, %arg4: memref<1x1x512xf32, #tpu.memory_space<vmem>>, %arg5: memref<16x256xf32, #tpu.memory_space<vmem>>) attributes {dimension_semantics = [#tpu.dimension_semantics<parallel>, #tpu.dimension_semantics<parallel>], iteration_bounds = array<i64: 1, 5>, scalar_prefetch = 0 : i64, scratch_operands = 0 : i64, tpu.core_type = #tpu.core_type<tc>, window_params = [{transform_indices = @transform_0, window_bounds = array<i64: 16, 320>}, {transform_indices = @transform_1, window_bounds = array<i64: 1, 320, 512>}, {transform_indices = @transform_2, window_bounds = array<i64: 1, 1, 512>}, {transform_indices = @transform_3, window_bounds = array<i64: 16, 256>}]} {
    %c0 = arith.constant 0 : index
    %c0_0 = arith.constant 0 : index
    %0 = vector.load %arg2[%c0, %c0_0] : memref<16x320xbf16, #tpu.memory_space<vmem>>, vector<16x320xbf16>
    %c0_1 = arith.constant 0 : index
    %c0_2 = arith.constant 0 : index
    %c0_3 = arith.constant 0 : index
    %1 = vector.load %arg3[%c0_1, %c0_2, %c0_3] : memref<1x320x512xbf16, #tpu.memory_space<vmem>>, vector<1x320x512xbf16>
    %2 = vector.shape_cast %1 : vector<1x320x512xbf16> to vector<320x512xbf16>
    %cst = arith.constant dense<0.000000e+00> : vector<16x512xf32>
    %3 = tpu.matmul %0, %2, %cst {dimension_numbers = #tpu.dot_dimension_numbers<[1], [0], [0], [1], [0, 0, 1, 1], [], []>} : vector<16x320xbf16>, vector<320x512xbf16>, vector<16x512xf32> -> vector<16x512xf32>
    %c0_4 = arith.constant 0 : index
    %c0_5 = arith.constant 0 : index
    %c0_6 = arith.constant 0 : index
    %4 = vector.load %arg4[%c0_4, %c0_5, %c0_6] : memref<1x1x512xf32, #tpu.memory_space<vmem>>, vector<1x1x512xf32>
    %5 = vector.shape_cast %4 : vector<1x1x512xf32> to vector<1x512xf32>
    %6 = vector.broadcast %5 : vector<1x512xf32> to vector<16x512xf32>
    %7 = arith.addf %3, %6 : vector<16x512xf32>
    %8 = vector.extract_strided_slice %7 {offsets = [0, 0], sizes = [16, 256], strides = [1, 1]} : vector<16x512xf32> to vector<16x256xf32>
    %9 = vector.extract_strided_slice %7 {offsets = [0, 256], sizes = [16, 256], strides = [1, 1]} : vector<16x512xf32> to vector<16x256xf32>
    %cst_7 = arith.constant 5.000000e-01 : f32
    %10 = vector.broadcast %cst_7 : f32 to vector<16x256xf32>
    %11 = arith.mulf %10, %9 : vector<16x256xf32>
    %cst_8 = arith.constant 0.707106769 : f32
    %12 = vector.broadcast %cst_8 : f32 to vector<16x256xf32>
    %13 = arith.mulf %9, %12 : vector<16x256xf32>
    %14 = math.erf %13 : vector<16x256xf32>
    %cst_9 = arith.constant 1.000000e+00 : f32
    %15 = vector.broadcast %cst_9 : f32 to vector<16x256xf32>
    %16 = arith.addf %15, %14 : vector<16x256xf32>
    %17 = arith.mulf %11, %16 : vector<16x256xf32>
    %18 = arith.mulf %8, %17 : vector<16x256xf32>
    %c0_10 = arith.constant 0 : index
    %c0_11 = arith.constant 0 : index
    %19 = vector.load %arg5[%c0_10, %c0_11] : memref<16x256xf32, #tpu.memory_space<vmem>>, vector<16x256xf32>
    tpu.vector_store %arg5[%c0_10, %c0_11], %18 {strides = array<i32>} : memref<16x256xf32, #tpu.memory_space<vmem>>, vector<16x256xf32>,
    return
  }
  func.func @transform_0(%arg0: i32, %arg1: i32) -> (i32, i32) {
    %c0_i32 = arith.constant 0 : i32
    %c0_i32_0 = arith.constant 0 : i32
    return %arg0, %c0_i32 : i32, i32
  }
  func.func @transform_1(%arg0: i32, %arg1: i32) -> (i32, i32, i32) {
    %c0_i32 = arith.constant 0 : i32
    %c0_i32_0 = arith.constant 0 : i32
    %c0_i32_1 = arith.constant 0 : i32
    return %arg1, %c0_i32, %c0_i32_0 : i32, i32, i32
  }
  func.func @transform_2(%arg0: i32, %arg1: i32) -> (i32, i32, i32) {
    %c0_i32 = arith.constant 0 : i32
    %c0_i32_0 = arith.constant 0 : i32
    %c0_i32_1 = arith.constant 0 : i32
    return %arg1, %c0_i32, %c0_i32_0 : i32, i32, i32
  }
  func.func @transform_3(%arg0: i32, %arg1: i32) -> (i32, i32) {
    %c0_i32 = arith.constant 0 : i32
    return %arg0, %arg1 : i32, i32
  }
}

</mosaic_0001>

<bundles_post_ra>
// kernel: geglu_pallas.1
= control target key start
LH: loop header
LB: loop body
LE: loop exit
PB: predicated region body
PF: predicated region fallthrough
CT: control target
= control target key end

     0   :  { %8 = vsyncpa [#allocation3], 0  ;;  %s1692_s0 = inlined_call_operand.vmem [shape: bf16[16,320], index: 0, kind: input, shape index: {}]   ;;  %s1693_s1 = inlined_call_operand.vmem [shape: bf16[5,320,512], index: 1, kind: input, shape index: {}]   ;;  %s1694_s2 = inlined_call_operand.vmem [shape: f32[5,1,512], index: 2, kind: input, shape index: {}]   ;;  %s1695_s3 = inlined_call_operand.hbm [shape: f32[16,1280], index: 3, kind: output, shape index: {}]  }
   0x1   :  { %10 = vsyncpa [#allocation3 + $0x1], 0  ;;  %s1465_s12 = smov 0   ;;  %s1467_s13 = smov 0  }
   0x2   :  { %s1469_s14 = smov 0   ;;  %s1471_s15 = smov 0  }
   0x3   :  { %s1473_s16 = smov 0   ;;  %s1475_s17 = smov 0  }
   0x4 LB: > { %s1070_s18 = sadd.s32 4294967295, %s1438_s17   ;;  %s1071_s19 = sadd.s32 4294967294, %s1438_s17   ;;  %s1438_s17 = sphi %s1475_s17, %s16_s17   ;;  %s1434_s16 = sphi %s1473_s16, %s1702_s16   ;;  %s1430_s15 = sphi %s1471_s15, %s1701_s15   ;;  %s1426_s14 = sphi %s1469_s14, %s1700_s14   ;;  %s1422_s13 = sphi %s1467_s13, %s1699_s13   ;;  %s1418_s12 = sphi %s1465_s12, %s1698_s12  }
   0x5   : > { %s25_s20 = sadd.s32 1, %s1434_s16  ;;  %s115_s21 = sadd.s32 1, %s1426_s14 }
   0x6   : > { %p26_p0 = scmp.ge.s32.totalorder %s25_s20, 5  ;;  %p125_p1 = scmp.ne.s32.totalorder %s1426_s14, %s1422_s13 }
   0x7   : > { %p126_p2 = scmp.eq.s32.totalorder %s1070_s18, 4  ;;  %p131_p3 = scmp.ne.s32.totalorder %s1422_s13, %s1418_s12 }
   0x8   : > { %s1704_s20 = smov (%p26_p0, %s25_s20), 0  ;;  %p132_p5 = scmp.eq.s32.totalorder %s1071_s19, 4 }
   0x9   : > { %p1505_p4 = por %p126_p2, %p125_p1  ;;  %s111_s23 = ssub.s32 %s1434_s16, %s1704_s20 }
   0xa   : > { %p1075_p6 = scmp.ge.s32.totalorder %s1438_s17, 1  ;;  %p113_p7 = scmp.eq.s32.totalorder %s111_s23, 0 }
   0xb   : > { %p1512_p8 = por %p132_p5, %p131_p3  ;;  %p175_p9 = scmp.lt.s32.totalorder %s1438_s17, 6 }
   0xc   : > { %s1518_s25 = scalar_select %p113_p7, %s1426_s14, %s115_s21  }
   0xd   : > { %p176_p10 = pnand %p1075_p6, %p175_p9 }
   0xe   : > { %p216_p11 = scmp.lt.s32.totalorder (!%p176_p10), %s1430_s15, 4  ;;  %s206_s21 = sand.u32 (!%p176_p10), 1, %s1422_s13  }
   0xf   : > { %179 = sbr.rel (%p176_p10) target bundleno = 347 (0x15b), region = 32  ;;  %s1076_s23 = sshll.u32 (!%p176_p10), %s206_s21, 5 }
  0x10   : > { %s1169_s28 = sshll.u32 (!%p176_p10), %s1430_s15, 8  ;;  %s1441_s6 = smov (!%p176_p10), [#allocation2]  }
  0x11   : > { %s1643_s4 = scalar_lea.hbm (!%p176_p10), %s1695_s3, %s1169_s28  ;;  %s1366_s7 = sshll.u32 (!%p176_p10), %s1441_s6, 4  ;;  %s1367_s7 = int_to_ptr.vmem [resolvable:$false] %s1366_s7 }
  0x12   : > { %s1368_s8 = scalar_lea.vmem (!%p176_p10), %s1367_s7, 1024 }
  0x14   : > { %v1440_v0 = vmov 0   ;;  %s1523_s26 = scalar_select %p216_p11, %s1430_s15, 4  ;;  %v1329_v1 = vld [vmem:[%s1692_s0 + $0x4] ss:$12 sps:$4 sm:$0xff]   ;;  %v1555_v20 = vld [vmem:[%s1692_s0 + $0x8] ss:$12 sps:$4 sm:$0xff]  }
  0x15   : > { %828 = vmatprep.mubr.bf16.mxu1 %v1440_v0  ;;  %785 = vmatprep.mubr.bf16.mxu0 %v1329_v1  ;;  %vm749_vm0 = vcmask 523264   ;;  %s1647_s15 = scalar_lea.sflag [#allocation3], %s206_s21 }
  0x16   : > { %s1170_s29 = smul.u32 640, %s1523_s26  ;;  %s1078_s10 = sshll.u32 %s1523_s26, 2 }
  0x17   : > { %s224_s19 = scalar_lea.vmem %s1694_s2, %s1078_s10  ;;  %s208_s26 = scalar_lea.vmem [#allocation2], %s1076_s23 }
  0x18   : > { %s1532_s5 = scalar_lea.vmem %s1693_s1, %s1170_s29  ;;  %s970_s27 = sshll.u32 %s208_s26, 4  ;;  %s1638_s27 = int_to_ptr.vmem [resolvable:$true] %s970_s27 }
  0x19   : > { %v1230_v2 = vld [vmem:[%s1532_s5 + $0xe4] ss:$16 sps:$4 sm:$0xff]   ;;  %v1234_v4 = vld [vmem:[%s1532_s5 + $0xe0] ss:$16 sps:$4 sm:$0xff]   ;;  %v1259_v19 = vld [vmem:[%s1532_s5 + $0xec] ss:$16 sps:$4 sm:$0xff]   ;;  %p1369_p1 = scmp.lt.s32.totalorder %s1638_s27, %s1367_s7 }
  0x1a   : > { %v1232_v3 = vld [vmem:[%s1532_s5 + $0x264] ss:$16 sps:$4 sm:$0xff]   ;;  %753 = vmatprep.subr.bf16.mxu0 %v1230_v2  ;;  %v1235_v5 = vld [vmem:[%s1532_s5 + $0x260] ss:$16 sps:$4 sm:$0xff]   ;;  %v1257_v21 = vld [vmem:[%s1532_s5 + $0xe8] ss:$16 sps:$4 sm:$0xff]  }
  0x1b   : > { %804 = vmatprep.subr.bf16.mxu1 %v1232_v3  ;;  %v1236_v6 = vld [vmem:[%s1532_s5 + $0xc4] ss:$16 sps:$4 sm:$0xff]   ;;  %754 = vmatpush1.bf16.msra.mxu0 %v1234_v4  ;;  %v1240_v8 = vld [vmem:[%s1532_s5 + $0xc0] ss:$16 sps:$4 sm:$0xff]   ;;  %v1265_v24 = vld [vmem:[%s1532_s5 + $0xcc] ss:$16 sps:$4 sm:$0xff]  }
  0x1c   : > { %805 = vmatpush1.bf16.msra.mxu1 %v1235_v5  ;;  %v1238_v7 = vld [vmem:[%s1532_s5 + $0x244] ss:$16 sps:$4 sm:$0xff]   ;;  %755 = vmatprep.subr.bf16.mxu0 %v1236_v6  ;;  %v1241_v9 = vld [vmem:[%s1532_s5 + $0x240] ss:$16 sps:$4 sm:$0xff]   ;;  %v1263_v25 = vld [vmem:[%s1532_s5 + $0xc8] ss:$16 sps:$4 sm:$0xff]  }
  0x1d   : > { %806 = vmatprep.subr.bf16.mxu1 %v1238_v7  ;;  %v1242_v10 = vld [vmem:[%s1532_s5 + $0xa4] ss:$16 sps:$4 sm:$0xff]   ;;  %v1246_v12 = vld [vmem:[%s1532_s5 + $0xa0] ss:$16 sps:$4 sm:$0xff]   ;;  %v1271_v28 = vld [vmem:[%s1532_s5 + $0xac] ss:$16 sps:$4 sm:$0xff]  }
  0x1e   : > { %v1244_v11 = vld [vmem:[%s1532_s5 + $0x224] ss:$16 sps:$4 sm:$0xff]   ;;  %v1247_v13 = vld [vmem:[%s1532_s5 + $0x220] ss:$16 sps:$4 sm:$0xff]   ;;  %v1269_v29 = vld [vmem:[%s1532_s5 + $0xa8] ss:$16 sps:$4 sm:$0xff]  }
  0x1f   : > { %756 = vmatpush1.bf16.msra.mxu0 %v1240_v8  ;;  %v1248_v14 = vld [vmem:[%s1532_s5 + $0x84] ss:$16 sps:$4 sm:$0xff]   ;;  %v1252_v16 = vld [vmem:[%s1532_s5 + $0x80] ss:$16 sps:$4 sm:$0xff]   ;;  %v1277_v32 = vld [vmem:[%s1532_s5 + $0x8c] ss:$16 sps:$4 sm:$0xff]  }
  0x20   : > { %807 = vmatpush1.bf16.msra.mxu1 %v1241_v9  ;;  %757 = vmatprep.subr.bf16.mxu0 %v1242_v10  ;;  %v1250_v15 = vld [vmem:[%s1532_s5 + $0x204] ss:$16 sps:$4 sm:$0xff]   ;;  %v1253_v17 = vld [vmem:[%s1532_s5 + $0x200] ss:$16 sps:$4 sm:$0xff]   ;;  %v1275_v33 = vld [vmem:[%s1532_s5 + $0x88] ss:$16 sps:$4 sm:$0xff]  }
  0x21   : > { %808 = vmatprep.subr.bf16.mxu1 %v1244_v11  ;;  %v1254_v18 = vld [vmem:[%s1532_s5 + $0x64] ss:$16 sps:$4 sm:$0xff]   ;;  %v1260_v22 = vld [vmem:[%s1532_s5 + $0x60] ss:$16 sps:$4 sm:$0xff]   ;;  %v1283_v36 = vld [vmem:[%s1532_s5 + $0x6c] ss:$16 sps:$4 sm:$0xff]  }
  0x22   : > { %v1261_v23 = vld [vmem:[%s1532_s5 + $0x44] ss:$16 sps:$4 sm:$0xff]   ;;  %v1266_v26 = vld [vmem:[%s1532_s5 + $0x40] ss:$16 sps:$4 sm:$0xff]   ;;  %v1281_v37 = vld [vmem:[%s1532_s5 + $0x68] ss:$16 sps:$4 sm:$0xff]  }
  0x23   : > { %758 = vmatpush1.bf16.msra.mxu0 %v1246_v12  ;;  %v1267_v27 = vld [vmem:[%s1532_s5 + $0x24] ss:$16 sps:$4 sm:$0xff]   ;;  %v1272_v30 = vld [vmem:[%s1532_s5 + $0x20] ss:$16 sps:$4 sm:$0xff]   ;;  %v1289_v40 = vld [vmem:[%s1532_s5 + $0x4c] ss:$16 sps:$4 sm:$0xff]  }
  0x24   : > { %809 = vmatpush1.bf16.msra.mxu1 %v1247_v13  ;;  %759 = vmatprep.subr.bf16.mxu0 %v1248_v14  ;;  %v1273_v31 = vld [vmem:[%s1532_s5 + $0x4] ss:$16 sps:$4 sm:$0xff]   ;;  %v1278_v34 = vld [vmem:[%s1532_s5] ss:$16 sps:$4 sm:$0xff]   ;;  %v1287_v41 = vld [vmem:[%s1532_s5 + $0x48] ss:$16 sps:$4 sm:$0xff]  }
  0x25   : > { %810 = vmatprep.subr.bf16.mxu1 %v1250_v15  ;;  %v1279_v35 = vld [vmem:[%s1532_s5 + $0x1e4] ss:$16 sps:$4 sm:$0xff]   ;;  %v1284_v38 = vld [vmem:[%s1532_s5 + $0x1e0] ss:$16 sps:$4 sm:$0xff]   ;;  %v1295_v44 = vld [vmem:[%s1532_s5 + $0x2c] ss:$16 sps:$4 sm:$0xff]  }
  0x26   : > { %v1285_v39 = vld [vmem:[%s1532_s5 + $0x1c4] ss:$16 sps:$4 sm:$0xff]   ;;  %v1290_v42 = vld [vmem:[%s1532_s5 + $0x1c0] ss:$16 sps:$4 sm:$0xff]   ;;  %v1293_v45 = vld [vmem:[%s1532_s5 + $0x28] ss:$16 sps:$4 sm:$0xff]  }
  0x27   : > { %760 = vmatpush1.bf16.msra.mxu0 %v1252_v16  ;;  %v1291_v43 = vld [vmem:[%s1532_s5 + $0x1a4] ss:$16 sps:$4 sm:$0xff]   ;;  %v1296_v46 = vld [vmem:[%s1532_s5 + $0x1a0] ss:$16 sps:$4 sm:$0xff]   ;;  %v1301_v48 = vld [vmem:[%s1532_s5 + $0xc] ss:$16 sps:$4 sm:$0xff]  }
  0x28   : > { %811 = vmatpush1.bf16.msra.mxu1 %v1253_v17  ;;  %761 = vmatprep.subr.bf16.mxu0 %v1254_v18  ;;  %v1297_v47 = vld [vmem:[%s1532_s5 + $0x184] ss:$16 sps:$4 sm:$0xff]   ;;  %v1299_v49 = vld [vmem:[%s1532_s5 + $0x8] ss:$16 sps:$4 sm:$0xff]   ;;  %v1302_v50 = vld [vmem:[%s1532_s5 + $0x180] ss:$16 sps:$4 sm:$0xff]  }
  0x29   : > { %839 = vmatprep.subr.bf16.mxu1 %v1259_v19  ;;  %v1303_v51 = vld [vmem:[%s1532_s5 + $0x164] ss:$16 sps:$4 sm:$0xff]   ;;  %v1307_v52 = vld [vmem:[%s1532_s5 + $0x1ec] ss:$16 sps:$4 sm:$0xff]   ;;  %v1305_v53 = vld [vmem:[%s1532_s5 + $0x1e8] ss:$16 sps:$4 sm:$0xff]  }
  0x2a   : > { %v1308_v54 = vld [vmem:[%s1532_s5 + $0x160] ss:$16 sps:$4 sm:$0xff]   ;;  %v1309_v55 = vld [vmem:[%s1532_s5 + $0x144] ss:$16 sps:$4 sm:$0xff]   ;;  %v1313_v56 = vld [vmem:[%s1532_s5 + $0x1cc] ss:$16 sps:$4 sm:$0xff]  }
  0x2b   : > { %1162 = vmatmul.mubr.msk.bf16.vlgmr.msra.gmra.mxu1 %vm749_vm0, %v1555_v20  ;;  %762 = vmatpush1.bf16.msra.mxu0 %v1260_v22  ;;  %v1311_v57 = vld [vmem:[%s1532_s5 + $0x1c8] ss:$16 sps:$4 sm:$0xff]   ;;  %v1314_v58 = vld [vmem:[%s1532_s5 + $0x140] ss:$16 sps:$4 sm:$0xff]   ;;  %v1315_v59 = vld [vmem:[%s1532_s5 + $0x124] ss:$16 sps:$4 sm:$0xff]  }
  0x2c   : > { %840 = vmatpush1.bf16.msra.mxu1 %v1257_v21  ;;  %763 = vmatprep.subr.bf16.mxu0 %v1261_v23  ;;  %v1319_v60 = vld [vmem:[%s1532_s5 + $0x1ac] ss:$16 sps:$4 sm:$0xff]   ;;  %v1317_v61 = vld [vmem:[%s1532_s5 + $0x1a8] ss:$16 sps:$4 sm:$0xff]   ;;  %v1320_v62 = vld [vmem:[%s1532_s5 + $0x120] ss:$16 sps:$4 sm:$0xff]   ;;  %v314_v23 = vlaneseq }
  0x2d   : > { %841 = vmatprep.subr.bf16.mxu1 %v1265_v24  ;;  %871 = vmatprep.mubr.bf16.mxu1 %v1329_v1  ;;  %v1321_v63 = vld [vmem:[%s1532_s5 + $0x104] ss:$16 sps:$4 sm:$0xff]   ;;  %v1325_v1 = vld [vmem:[%s1532_s5 + $0x18c] ss:$16 sps:$4 sm:$0xff]   ;;  %v1323_v2 = vld [vmem:[%s1532_s5 + $0x188] ss:$16 sps:$4 sm:$0xff]  }
  0x2e   : > { %v1326_v3 = vld [vmem:[%s1532_s5 + $0x100] ss:$16 sps:$4 sm:$0xff]   ;;  %v1332_v4 = vld [vmem:[%s1532_s5 + $0x16c] ss:$16 sps:$4 sm:$0xff]   ;;  %v1330_v7 = vld [vmem:[%s1532_s5 + $0x168] ss:$16 sps:$4 sm:$0xff]  }
  0x2f   : > { %764 = vmatpush1.bf16.msra.mxu0 %v1266_v26  ;;  %v1335_v5 = vld [vmem:[%s1532_s5 + $0x26c] ss:$16 sps:$4 sm:$0xff]   ;;  %v1333_v8 = vld [vmem:[%s1532_s5 + $0x268] ss:$16 sps:$4 sm:$0xff]   ;;  %v315_v26 = vshrl.u32 %v314_v23, 7 }
  0x30   : > { %842 = vmatpush1.bf16.msra.mxu1 %v1263_v25  ;;  %765 = vmatprep.subr.bf16.mxu0 %v1267_v27  ;;  %v1327_v6 = vld [vmem:[%s1692_s0] ss:$12 sps:$4 sm:$0xff]   ;;  %v1336_v11 = vld [vmem:[%s1532_s5 + $0x148] ss:$16 sps:$4 sm:$0xff]  }
  0x31   : > { %843 = vmatprep.subr.bf16.mxu1 %v1271_v28  ;;  %v1338_v9 = vld [vmem:[%s1532_s5 + $0x14c] ss:$16 sps:$4 sm:$0xff]   ;;  %v1339_v12 = vld [vmem:[%s1532_s5 + $0x248] ss:$16 sps:$4 sm:$0xff]   ;;  %v324_v27 = vsub.s32 2, %v315_v26 }
  0x32   : > { %v1341_v10 = vld [vmem:[%s1532_s5 + $0x24c] ss:$16 sps:$4 sm:$0xff]   ;;  %v1342_v15 = vld [vmem:[%s1532_s5 + $0x128] ss:$16 sps:$4 sm:$0xff]  }
  0x33   : > { %766 = vmatpush1.bf16.msra.mxu0 %v1272_v30  ;;  %v1344_v13 = vld [vmem:[%s1532_s5 + $0x12c] ss:$16 sps:$4 sm:$0xff]   ;;  %v1345_v16 = vld [vmem:[%s1532_s5 + $0x228] ss:$16 sps:$4 sm:$0xff]   ;;  %v328_v30 = vsub.s32 3, %v315_v26 }
  0x34   : > { %844 = vmatpush1.bf16.msra.mxu1 %v1269_v29  ;;  %767 = vmatprep.subr.bf16.mxu0 %v1273_v31  ;;  %v1347_v14 = vld [vmem:[%s1532_s5 + $0x22c] ss:$16 sps:$4 sm:$0xff]   ;;  %v1348_v19 = vld [vmem:[%s1532_s5 + $0x108] ss:$16 sps:$4 sm:$0xff]   ;;  %v312_v31 = vld [vmem:[%s224_s19] sm:$0xf] }
  0x35   : > { %845 = vmatprep.subr.bf16.mxu1 %v1277_v32  ;;  %v1350_v17 = vld [vmem:[%s1532_s5 + $0x10c] ss:$16 sps:$4 sm:$0xff]   ;;  %v1351_v21 = vld [vmem:[%s1532_s5 + $0x208] ss:$16 sps:$4 sm:$0xff]   ;;  %v325_v32 = vrot.slane %v312_v31, %v324_v27 }
  0x36   : > { %v1353_v18 = vld [vmem:[%s1532_s5 + $0x20c] ss:$16 sps:$4 sm:$0xff]   ;;  %s1362_s5 = scalar_lea.vmem %s1638_s27, 512 }
  0x37   : > { %768 = vmatpush1.bf16.msra.mxu0 %v1278_v34  ;;  %v329_v34 = vrot.slane %v312_v31, %v328_v30  ;;  %p1363_p12 = scmp.ne.s32.totalorder %s1638_s27, %s1362_s5  ;;  %p1370_p2 = scmp.lt.s32.totalorder %s1368_s8, %s1362_s5 }
  0x38   : > { %846 = vmatpush1.bf16.msra.mxu1 %v1275_v33  ;;  %769 = vmatprep.subr.bf16.mxu0 %v1279_v35 }
  0x39   : > { %847 = vmatprep.subr.bf16.mxu1 %v1283_v36  ;;  %p1364_p13 = pnand %p1363_p12, %p1505_p4  ;;  %p1371_p3 = por %p1370_p2, %p1369_p1 }
  0x3b   : > { %770 = vmatpush2.bf16.msra.mxu0 %v1284_v38  ;;  %p1365_p0 = pneg %p1364_p13 }
  0x3c   : > { %848 = vmatpush1.bf16.msra.mxu1 %v1281_v37  ;;  %771 = vmatprep.subr.bf16.mxu0 %v1285_v39 }
  0x3d   : > { %849 = vmatprep.subr.bf16.mxu1 %v1289_v40  ;;  %p1372_p5 = pnand %p1371_p3, %p1365_p0 }
  0x3f   : > { %772 = vmatpush2.bf16.msra.mxu0 %v1290_v42 }
  0x40   : > { %850 = vmatpush1.bf16.msra.mxu1 %v1287_v41  ;;  %773 = vmatprep.subr.bf16.mxu0 %v1291_v43 }
  0x41   : > { %851 = vmatprep.subr.bf16.mxu1 %v1295_v44 }
  0x43   : > { %774 = vmatpush2.bf16.msra.mxu0 %v1296_v46 }
  0x44   : > { %852 = vmatpush1.bf16.msra.mxu1 %v1293_v45  ;;  %775 = vmatprep.subr.bf16.mxu0 %v1297_v47 }
  0x45   : > { %853 = vmatprep.subr.bf16.mxu1 %v1301_v48 }
  0x47   : > { %776 = vmatpush2.bf16.msra.mxu0 %v1302_v50 }
  0x48   : > { %854 = vmatpush1.bf16.msra.mxu1 %v1299_v49  ;;  %777 = vmatprep.subr.bf16.mxu0 %v1303_v51 }
  0x49   : > { %855 = vmatprep.subr.bf16.mxu1 %v1307_v52 }
  0x4b   : > { %778 = vmatpush2.bf16.msra.mxu0 %v1308_v54 }
  0x4c   : > { %856 = vmatpush2.bf16.msra.mxu1 %v1305_v53  ;;  %779 = vmatprep.subr.bf16.mxu0 %v1309_v55  ;;  %v316_v53 = vsub.s32 0, %v315_v26  ;;  %v320_v55 = vsub.s32 1, %v315_v26 }
  0x4d   : > { %857 = vmatprep.subr.bf16.mxu1 %v1313_v56 }
  0x4f   : > { %780 = vmatpush2.bf16.msra.mxu0 %v1314_v58  ;;  %v321_v58 = vrot.slane %v312_v31, %v320_v55 }
  0x50   : > { %858 = vmatpush2.bf16.msra.mxu1 %v1311_v57  ;;  %781 = vmatprep.subr.bf16.mxu0 %v1315_v59  ;;  %v317_v57 = vrot.slane %v312_v31, %v316_v53 }
  0x51   : > { %859 = vmatprep.subr.bf16.mxu1 %v1319_v60 }
  0x53   : > { %782 = vmatpush2.bf16.msra.mxu0 %v1320_v62 }
  0x54   : > { %860 = vmatpush2.bf16.msra.mxu1 %v1317_v61  ;;  %783 = vmatprep.subr.bf16.mxu0 %v1321_v63 }
  0x55   : > { %861 = vmatprep.subr.bf16.mxu1 %v1325_v1 }
  0x57   : > { %784 = vmatpush2.bf16.msra.mxu0 %v1326_v3 }
  0x58   : > { %862 = vmatpush2.bf16.msra.mxu1 %v1323_v2  ;;  %890 = vmatprep.subr.bf16.mxu0 %v1335_v5 }
  0x59   : > { %863 = vmatprep.subr.bf16.mxu1 %v1332_v4 }
  0x5a   : > { %786 = vmatmul.mubr.bf16.vlgmr.msra.gmra.mxu0 %v1327_v6 }
  0x5b   : > { %891 = vmatpush1.bf16.msra.mxu0 %v1333_v8  ;;  %914 = vmatprep.mubr.bf16.mxu0 %v1440_v0 }
  0x5c   : > { %864 = vmatpush2.bf16.msra.mxu1 %v1330_v7  ;;  %892 = vmatprep.subr.bf16.mxu0 %v1341_v10 }
  0x5d   : > { %865 = vmatprep.subr.bf16.mxu1 %v1338_v9 }
  0x5f   : > { %893 = vmatpush1.bf16.msra.mxu0 %v1339_v12 }
  0x60   : > { %866 = vmatpush2.bf16.msra.mxu1 %v1336_v11  ;;  %894 = vmatprep.subr.bf16.mxu0 %v1347_v14 }
  0x61   : > { %867 = vmatprep.subr.bf16.mxu1 %v1344_v13 }
  0x63   : > { %895 = vmatpush1.bf16.msra.mxu0 %v1345_v16 }
  0x64   : > { %868 = vmatpush2.bf16.msra.mxu1 %v1342_v15  ;;  %896 = vmatprep.subr.bf16.mxu0 %v1353_v18 }
  0x65   : > { %869 = vmatprep.subr.bf16.mxu1 %v1350_v17 }
  0x67   : > { %897 = vmatpush1.bf16.msra.mxu0 %v1351_v21 }
  0x68   : > { %870 = vmatpush2.bf16.msra.mxu1 %v1348_v19 }
  0x6a   : > { %1163 = vmatmul.mubr.msk.bf16.vlgmr.msra.gmra.mxu0 %vm749_vm0, %v1555_v20 }
  0x6b   : > { %872 = vmatmul.mubr.bf16.vlgmr.msra.gmra.mxu1 %v1327_v6 }
  0xeb   : > { %v830_v0 = vpop.f32.mrf.mxu1 }
  0xed   : > { %v832_v24 = vpop.f32.mrf.mxu1 }
  0xef   : > { %v834_v28 = vpop.f32.mrf.mxu1 }
  0xf1   : > { %v1631_v33 = vpop.f32.mrf.mxu1 }
 0x11a   : > { %v787_v22 = vpop.f32.mrf.mxu0 }
 0x11b   : > { %v788_v59 = vadd.f32 %v787_v22, %v317_v57 }
 0x11c   : > { %v789_v25 = vpop.f32.mrf.mxu0 }
 0x11d   : > { %v790_v61 = vadd.f32 %v789_v25, %v321_v58  ;;  %v831_v2 = vadd.f32 %v830_v0, %v788_v59 }
 0x11e   : > { %v791_v29 = vpop.f32.mrf.mxu0 }
 0x11f   : > { %v792_v3 = vadd.f32 %v791_v29, %v317_v57  ;;  %v833_v8 = vadd.f32 %v832_v24, %v790_v61 }
 0x120   : > { %v793_v20 = vpop.f32.mrf.mxu0 }
 0x121   : > { %v794_v13 = vadd.f32 %v793_v20, %v321_v58  ;;  %v835_v15 = vadd.f32 %v834_v28, %v792_v3 }
 0x123   : > { %v837_v0 = vadd.f32 %v1631_v33, %v794_v13 }
 0x12a   : > { %v916_v36 = vpop.f32.mrf.mxu0 }
 0x12b   : > { %v873_v35 = vpop.f32.mrf.mxu1 }
 0x12c   : > { %v874_v37 = vadd.f32 %v873_v35, %v325_v32  ;;  %v918_v39 = vpop.f32.mrf.mxu0 }
 0x12d   : > { %v875_v38 = vpop.f32.mrf.mxu1 }
 0x12e   : > { %v917_v40 = vadd.f32 %v916_v36, %v874_v37  ;;  %v876_v41 = vadd.f32 %v875_v38, %v329_v34  ;;  %v920_v46 = vpop.f32.mrf.mxu0 }
 0x12f   : > { %v877_v42 = vpop.f32.mrf.mxu1 }
 0x130   : > { %v929_v43 = vmul.f32 0.70710677, %v917_v40  ;;  %v919_v44 = vadd.f32 %v918_v39, %v876_v41  ;;  %v878_v45 = vadd.f32 %v877_v42, %v325_v32  ;;  %v922_v52 = vpop.f32.mrf.mxu0  ;;  %v925_v62 = vmul.f32 0.5, %v917_v40 }
 0x131   : > { %v879_v47 = vpop.f32.mrf.mxu1 }
 0x132   : > { %1354 = verf.f32 %v929_v43  ;;  %v930_v48 = vmul.f32 0.70710677, %v919_v44  ;;  %v921_v49 = vadd.f32 %v920_v46, %v878_v45  ;;  %v880_v50 = vadd.f32 %v879_v47, %v329_v34 }
 0x133   : > { %v926_v5 = vmul.f32 0.5, %v919_v44 }
 0x134   : > { %1356 = verf.f32 %v930_v48  ;;  %v931_v51 = vmul.f32 0.70710677, %v921_v49  ;;  %v923_v54 = vadd.f32 %v922_v52, %v880_v50  ;;  %v927_v11 = vmul.f32 0.5, %v921_v49 }
 0x136   : > { %1358 = verf.f32 %v931_v51  ;;  %v932_v56 = vmul.f32 0.70710677, %v923_v54  ;;  %v928_v18 = vmul.f32 0.5, %v923_v54 }
 0x138   : > { %1360 = verf.f32 %v932_v56 }
 0x13f   : > { %v1355_v60 = vpop.eup %1354 }
 0x140   : > { %v937_v63 = vadd.f32 1.0, %v1355_v60 }
 0x141   : > { %v1357_v1 = vpop.eup %1356 }
 0x142   : > { %v941_v4 = vmul.f32 %v937_v63, %v925_v62  ;;  %v938_v6 = vadd.f32 1.0, %v1357_v1 }
 0x143   : > { %v1359_v7 = vpop.eup %1358 }
 0x144   : > { %v945_v9 = vmul.f32 %v941_v4, %v831_v2  ;;  %v942_v10 = vmul.f32 %v938_v6, %v926_v5  ;;  %v939_v12 = vadd.f32 1.0, %v1359_v7 }
 0x145   : > { %v1361_v14 = vpop.eup %1360 }
 0x146   : > { %949 = vst [vmem:[%s208_s26] sm:$0xff] %v945_v9  ;;  %v946_v16 = vmul.f32 %v942_v10, %v833_v8  ;;  %v943_v17 = vmul.f32 %v939_v12, %v927_v11  ;;  %v940_v19 = vadd.f32 1.0, %v1361_v14 }
 0x148   : > { %950 = vst [vmem:[%s208_s26 + $0x8] sm:$0xff] %v946_v16  ;;  %v947_v21 = vmul.f32 %v943_v17, %v835_v15  ;;  %v944_v22 = vmul.f32 %v940_v19, %v928_v18 }
 0x14a   : > { %951 = vst [vmem:[%s208_s26 + $0x10] sm:$0xff] %v947_v21  ;;  %v948_v23 = vmul.f32 %v944_v22, %v837_v0 }
 0x14c   : > { %952 = vst [vmem:[%s208_s26 + $0x18] sm:$0xff] %v948_v23 }
 0x14d   : > { %1375 = shalt.err (!%p1372_p5)
}
 0x14e   : > { %s1376_s9 = scalar_lea.hbm %s1643_s4, 512  ;;  %s1380_s18 = scalar_lea.hbm %s1695_s3, 2560 }
 0x14f   : > { %p1377_p6 = scmp.ne.s32.totalorder %s1643_s4, %s1376_s9  ;;  %p1381_p10 = scmp.lt.s32.totalorder %s1643_s4, %s1695_s3 }
 0x150   : > { %p1382_p11 = scmp.lt.s32.totalorder %s1380_s18, %s1376_s9 }
 0x151   : > { %p1378_p7 = pnand %p1377_p6, %p1505_p4 }
 0x152   : > { %p1383_p12 = por %p1382_p11, %p1381_p10 }
 0x153   : > { %p1379_p9 = pneg %p1378_p7 }
 0x155   : > { %p1384_p13 = pnand %p1383_p12, %p1379_p9 }
 0x157   : > { %1387 = shalt.err (!%p1384_p13)
}
 0x158   : > { %s1442_s23 = smov 256   ;;  %s1443_s26 = smov 1280  }
 0x159   : > { %s1444_s28 = smov 16  }
 0x15a   : > { %1171 = dma.vmem_to_hbm [thread:$0]  (%p1505_p4), %s1638_s27, 512, %s1643_s4, %s1647_s15, %s1442_s23, %s1443_s26, %s1444_s28  }
 0x15b PF: > { %p1177_p0 = scmp.ge.s32.totalorder %s1438_s17, 2  ;;  %s985_s29 = sand.u32 1, %s1418_s12  }
 0x15c   : > { %s986_s30 = scalar_lea.sflag [#allocation3], %s985_s29 }
 0x15d   : > { %p1174_p1 = pnand %p1177_p0, %p1512_p8 }
 0x15f   : > { %p1175_p2 = pneg %p1174_p1 }
 0x161   : > { %1413 = dma.done.wait (%p1175_p2), %s986_s30, 512  }
 0x162   : > { %1415 = vsyncadd (%p1175_p2), %s986_s30, 4294966784  ;;  %s16_s17 = sadd.s32 1, %s1438_s17   ;;  %s1698_s12 = smov %s1422_s13 }
 0x163   : > { %p13_p3 = scmp.ge.s32.totalorder %s16_s17, 7   ;;  %s1699_s13 = smov %s1426_s14 }
 0x164   : > { %s1700_s14 = smov %s1518_s25  ;;  %s1701_s15 = smov %s1434_s16 }
 0x165   : > { %s1702_s16 = smov %s1704_s20  ;;  %15 = sbr.rel (!%p13_p3) target bundleno = 4 (0x4), region = 73 }
 0x16a   :  { %991 = vsyncpa [#allocation3], 1 }
 0x16b   :  { %993 = vsyncpa [#allocation3 + $0x1], 1 }

</bundles_post_ra>
